<compile_context>
chip_gen: v5e
topology: v5e:2x2
jax: 0.10.0
libtpu: 0.0.40
codegen_flags: <defaults>
</compile_context>

<pallas_src>
import jax
import jax.numpy as jnp
from jax import lax
from jax.experimental import pallas as pl
from jax.experimental.pallas import tpu as pltpu

LANE = 128
SUBLANE = 8

CHUNK_ROWS = 256          # in-kernel accumulation chunk: (256,128) f32 = 128 KB live
MAX_TILE_ROWS = 1024      # per-block tile: (1024,128) f32 = 512 KB / input / buffer
TARGET_BLOCKS = 8         # aim for >= 8 grid steps on large inputs

# Loss hyper-parameters (from the module __init__)
SMOOTH = 1.0              # DiceLoss.smooth
ALPHA = 0.01              # WeightedFocalLoss.alpha -> alpha tensor [0.01, 0.99]
W_DICE = 1.0
W_FOCAL = 100.0
# GAMMA == 2 is hard-coded as a squared factor below.


def _make_loss_kernel(n_valid, tile_rows, chunk_rows):
    """Kernel over one (tile_rows, 128) block; writes (1,4,8,128) partial sums."""
    num_chunks = tile_rows // chunk_rows
    chunk_groups = chunk_rows // SUBLANE
    chunk_elems = chunk_rows * LANE
    block_elems = tile_rows * LANE

    def kernel(x_ref, t_ref, out_ref):
        # Valid elements remaining from the start of this block (n_valid is a
        # static Python int, so no scalar prefetch is needed).
        rem = n_valid - pl.program_id(0) * block_elems

        # Flat element index within one chunk. Loop-invariant -> hoisted out of
        # the accumulation loop (JAX does not CSE broadcast_in_dim).
        local_idx = (
            lax.broadcasted_iota(jnp.int32, (chunk_rows, LANE), 0) * LANE
            + lax.broadcasted_iota(jnp.int32, (chunk_rows, LANE), 1))

        def chunk_body(c, carry):
            acc_pt, acc_pp, acc_tt, acc_f = carry
            r0 = pl.multiple_of(c * chunk_rows, chunk_rows)
            xr = x_ref[pl.ds(r0, chunk_rows), :].astype(jnp.float32)
            tr = t_ref[pl.ds(r0, chunk_rows), :].astype(jnp.float32)

            # Tail mask: out-of-range elements (grid padding / lane padding /
            # stale VMEM of a partial block) are driven to logits=-1e9, targets=0
            # so every partial contribution below is exactly zero.
            valid = local_idx < (rem - c * chunk_elems)
            x = jnp.where(valid, xr, jnp.float32(-1e9))
            t = jnp.where(valid, tr, jnp.float32(0.0))

            # Shared-exponential sigmoid + BCE (binary targets):
            #   z   = x if t==1 else -x
            #   p_t = sigmoid(z) = 1/(1+exp(-z))          (prob of the true class)
            #   bce = -clamp(log(p_t), -100) = min(log1p(exp(-z)), 100)
            #   p   = sigmoid(x) = p_t if t==1 else 1 - p_t
            #   exp(-bce) == p_t (up to the negligible exp(-100) clamp floor)
            pos = t > 0.5
            z = jnp.where(pos, x, -x)
            e = jnp.exp(-z)
            p_t = 1.0 / (1.0 + e)           # exact divide (approx recip risks tolerance)
            bce = jnp.minimum(jnp.log1p(e), 100.0)
            p = jnp.where(pos, p_t, 1.0 - p_t)

            at = ALPHA + (1.0 - 2.0 * ALPHA) * t    # == [ALPHA, 1-ALPHA][t] for t in {0,1}
            one_m_pt = 1.0 - p_t
            focal = at * one_m_pt * one_m_pt * bce  # gamma == 2

            def red(v):
                # (chunk_rows,128) -> (groups,8,128) -> sum over groups:
                # pure vreg adds, no cross-lane XLU work.
                return v.reshape(chunk_groups, SUBLANE, LANE).sum(axis=0)

            return (acc_pt + red(p * t),
                    acc_pp + red(p * p),
                    acc_tt + red(t * t),
                    acc_f + red(focal))

        zeros = jnp.zeros((SUBLANE, LANE), jnp.float32)
        acc_pt, acc_pp, acc_tt, acc_f = lax.fori_loop(
            0, num_chunks, chunk_body, (zeros, zeros, zeros, zeros), unroll=True)

        out_ref[0, 0] = acc_pt
        out_ref[0, 1] = acc_pp
        out_ref[0, 2] = acc_tt
        out_ref[0, 3] = acc_f

    return kernel


def loss_forward(preds, targets):
    """Returns (dice_loss, focal_loss) exactly as Loss.forward (binary targets)."""
    p = jnp.squeeze(preds)                         # torch.squeeze: drop size-1 dims
    if p.size != targets.size:
        raise ValueError(
            f"squeeze(preds) has {p.size} elements but targets has {targets.size}; "
            "the BCE/focal term requires matching element counts.")
    x = p.reshape(-1)                              # keep original dtype (bf16 stays bf16)
    t = targets.reshape(-1)
    n = x.shape[0]

    # Lane-dense 2-D view (rows, 128) with rows rounded up to a sublane multiple
    # so every row-tile is (8,128)-aligned. For the common case n % 1024 == 0 this
    # is a zero-copy reshape; otherwise a single small pad copy.
    rows = -(-n // LANE)
    rows_arr = -(-rows // SUBLANE) * SUBLANE
    n_arr = rows_arr * LANE
    if n_arr != n:
        # TODO(synk): a 1-D BlockSpec path would remove this copy for element
        # counts that are not multiples of 1024; the padded elements are masked
        # in-kernel anyway (any pad value is fine).
        x = jnp.pad(x, (0, n_arr - n))
        t = jnp.pad(t, (0, n_arr - n))
    x2 = x.reshape(rows_arr, LANE)
    t2 = t.reshape(rows_arr, LANE)

    # Tile selection: ~0.5 MB f32 per input per buffer keeps the kernel on the HBM
    # roofline everywhere (v5e 16 MiB scoped-VMEM default, v7x 64 MiB physical),
    # while giving >= TARGET_BLOCKS grid steps on large inputs so DMA overlaps
    # compute and the "parallel" axis can shard across v7x's two TensorCores.
    if rows_arr <= CHUNK_ROWS:
        tile_rows = rows_arr
    else:
        target = -(-rows_arr // TARGET_BLOCKS)
        tile_rows = min(MAX_TILE_ROWS,
                        max(CHUNK_ROWS, -(-target // CHUNK_ROWS) * CHUNK_ROWS))
    num_blocks = -(-rows_arr // tile_rows)
    chunk_rows = min(CHUNK_ROWS, tile_rows)        # tile_rows % chunk_rows == 0

    kernel = _make_loss_kernel(n, tile_rows, chunk_rows)
    partials = pl.pallas_call(
        kernel,
        out_shape=jax.ShapeDtypeStruct((num_blocks, 4, SUBLANE, LANE), jnp.float32),
        grid_spec=pltpu.PrefetchScalarGridSpec(
            num_scalar_prefetch=0,
            grid=(num_blocks,),
            in_specs=[
                pl.BlockSpec((tile_rows, LANE), lambda i: (i, 0)),
                pl.BlockSpec((tile_rows, LANE), lambda i: (i, 0)),
            ],
            out_specs=pl.BlockSpec((1, 4, SUBLANE, LANE), lambda i: (i, 0, 0, 0)),
        ),
        compiler_params=pltpu.CompilerParams(
            dimension_semantics=("parallel",),     # independent blocks; 2-TC sharding on v7x
        ),
    )(x2, t2)

    sums = jnp.sum(partials, axis=(0, 2, 3))       # tiny final reduction -> (4,)
    pt_sum, pp_sum, tt_sum, f_sum = sums[0], sums[1], sums[2], sums[3]

    # Dice loss
    numerator = 2.0 * pt_sum + SMOOTH
    denominator = pp_sum + tt_sum + SMOOTH
    dice_loss = (1.0 - numerator / denominator) * W_DICE

    # Focal loss (mean over original elements, NaN/Inf -> 0, then * w_focal)
    f_mean = f_sum / jnp.float32(n)
    f_mean = jnp.where(jnp.isnan(f_mean) | jnp.isinf(f_mean),
                       jnp.float32(0.0), f_mean)
    focal_loss = f_mean * W_FOCAL

    return dice_loss, focal_loss


def _reference_loss(preds, targets):
    """Pure-JAX reference mirroring the PyTorch forward (original formulation)."""
    p = jax.nn.sigmoid(jnp.squeeze(preds).astype(jnp.float32))
    t = targets.astype(jnp.float32)
    num = 2.0 * jnp.sum(p * t) + SMOOTH
    den = jnp.sum(p * p) + jnp.sum(t * t) + SMOOTH
    dice = (1.0 - num / den) * W_DICE

    pf = p.reshape(-1)
    tf = t.reshape(-1)
    log_p = jnp.maximum(jnp.log(pf), -100.0)
    log_1mp = jnp.maximum(jnp.log(1.0 - pf), -100.0)
    bce = -(tf * log_p + (1.0 - tf) * log_1mp)
    at = jnp.where(tf.astype(jnp.int32) == 0, ALPHA, 1.0 - ALPHA)
    pt = jnp.exp(-bce)
    f_mean = jnp.mean(at * (1.0 - pt) ** 2 * bce)
    f_mean = jnp.where(jnp.isnan(f_mean) | jnp.isinf(f_mean), 0.0, f_mean)
    return dice, f_mean * W_FOCAL


if __name__ == "__main__":
    key = jax.random.PRNGKey(0)
    loss_fn = jax.jit(loss_forward)

    # Primary small example: NCHW preds with a singleton channel, binary targets.
    # (512 elements -> single block, exercises the in-kernel tail mask.)
    k1, k2 = jax.random.split(key)
    B, C, H, W = 2, 1, 16, 16
    preds = jax.random.normal(k1, (B, C, H, W), dtype=jnp.float32)
    targets = jax.random.bernoulli(k2, p=0.3, shape=(B, H, W)).astype(jnp.float32)

    dice_loss, focal_loss = loss_fn(preds, targets)
    jax.block_until_ready((dice_loss, focal_loss))

    dice_ref, focal_ref = _reference_loss(preds, targets)
    assert jnp.allclose(dice_loss, dice_ref, rtol=1e-4, atol=1e-5), (dice_loss, dice_ref)
    assert jnp.allclose(focal_loss, focal_ref, rtol=1e-4, atol=1e-5), (focal_loss, focal_ref)

    # Second check: zero-copy view path, multi-block grid, partial (masked) last block.
    k3, k4 = jax.random.split(k1)
    B2, H2, W2 = 2, 144, 128                        # 36864 elems -> 288 rows -> 2 blocks
    preds2 = jax.random.normal(k3, (B2, 1, H2, W2), dtype=jnp.float32)
    targets2 = jax.random.bernoulli(k4, p=0.3, shape=(B2, H2, W2)).astype(jnp.float32)
    d2, f2 = loss_fn(preds2, targets2)
    jax.block_until_ready((d2, f2))
    d2_ref, f2_ref = _reference_loss(preds2, targets2)
    assert jnp.allclose(d2, d2_ref, rtol=1e-4, atol=1e-5), (d2, d2_ref)
    assert jnp.allclose(f2, f2_ref, rtol=1e-4, atol=1e-5), (f2, f2_ref)

    print("KERNEL_OK")
</pallas_src>

<mosaic_0001>
module attributes {stable_mosaic.version = 11 : i64} {
  func.func @kernel(%arg0: i32, %arg1: memref<8x128xf32, #tpu.memory_space<vmem>>, %arg2: memref<8x128xf32, #tpu.memory_space<vmem>>, %arg3: memref<1x4x8x128xf32, #tpu.memory_space<vmem>>) attributes {dimension_semantics = [#tpu.dimension_semantics<parallel>], iteration_bounds = array<i64: 1>, scalar_prefetch = 0 : i64, scratch_operands = 0 : i64, tpu.core_type = #tpu.core_type<tc>, window_params = [{transform_indices = @transform_0, window_bounds = array<i64: 8, 128>}, {transform_indices = @transform_1, window_bounds = array<i64: 8, 128>}, {transform_indices = @transform_2, window_bounds = array<i64: 1, 4, 8, 128>}]} {
    %c1024_i32 = arith.constant 1024 : i32
    %0 = arith.muli %arg0, %c1024_i32 : i32
    %c512_i32 = arith.constant 512 : i32
    %1 = arith.subi %c512_i32, %0 : i32
    %2 = tpu.iota {dimensions = array<i32: 0>} : vector<8x128xi32>
    %c128_i32 = arith.constant 128 : i32
    %3 = vector.broadcast %c128_i32 : i32 to vector<8x128xi32>
    %4 = arith.muli %2, %3 : vector<8x128xi32>
    %5 = tpu.iota {dimensions = array<i32: 1>} : vector<8x128xi32>
    %6 = arith.addi %4, %5 : vector<8x128xi32>
    %cst = arith.constant 0.000000e+00 : f32
    %7 = vector.broadcast %cst : f32 to vector<8x128xf32>
    %c0_i32 = arith.constant 0 : i32
    %c8_i32 = arith.constant 8 : i32
    %8 = arith.muli %c0_i32, %c8_i32 : i32
    %9 = tpu.assume_multiple %8, 8 : i32
    %10 = arith.index_cast %9 : i32 to index
    %c0 = arith.constant 0 : index
    %11 = vector.load %arg1[%10, %c0] : memref<8x128xf32, #tpu.memory_space<vmem>>, vector<8x128xf32>
    %12 = arith.index_cast %9 : i32 to index
    %c0_0 = arith.constant 0 : index
    %13 = vector.load %arg2[%12, %c0_0] : memref<8x128xf32, #tpu.memory_space<vmem>>, vector<8x128xf32>
    %c1024_i32_1 = arith.constant 1024 : i32
    %14 = arith.muli %c0_i32, %c1024_i32_1 : i32
    %15 = arith.subi %1, %14 : i32
    %16 = vector.broadcast %15 : i32 to vector<8x128xi32>
    %17 = arith.cmpi slt, %6, %16 : vector<8x128xi32>
    %cst_2 = arith.constant -1.000000e+09 : f32
    %18 = vector.broadcast %cst_2 : f32 to vector<8x128xf32>
    %19 = arith.select %17, %11, %18 : vector<8x128xi1>, vector<8x128xf32>
    %cst_3 = arith.constant 0.000000e+00 : f32
    %20 = vector.broadcast %cst_3 : f32 to vector<8x128xf32>
    %21 = arith.select %17, %13, %20 : vector<8x128xi1>, vector<8x128xf32>
    %cst_4 = arith.constant 5.000000e-01 : f32
    %22 = vector.broadcast %cst_4 : f32 to vector<8x128xf32>
    %23 = arith.cmpf ogt, %21, %22 : vector<8x128xf32>
    %cst_5 = arith.constant 0.000000e+00 : f32
    %24 = vector.broadcast %cst_5 : f32 to vector<8x128xf32>
    %25 = arith.subf %24, %19 : vector<8x128xf32>
    %26 = arith.select %23, %19, %25 : vector<8x128xi1>, vector<8x128xf32>
    %cst_6 = arith.constant 0.000000e+00 : f32
    %27 = vector.broadcast %cst_6 : f32 to vector<8x128xf32>
    %28 = arith.subf %27, %26 : vector<8x128xf32>
    %29 = math.exp %28 : vector<8x128xf32>
    %cst_7 = arith.constant 1.000000e+00 : f32
    %30 = vector.broadcast %cst_7 : f32 to vector<8x128xf32>
    %31 = arith.addf %30, %29 : vector<8x128xf32>
    %cst_8 = arith.constant 1.000000e+00 : f32
    %32 = vector.broadcast %cst_8 : f32 to vector<8x128xf32>
    %33 = arith.divf %32, %31 : vector<8x128xf32>
    %34 = math.log1p %29 : vector<8x128xf32>
    %cst_9 = arith.constant 1.000000e+02 : f32
    %35 = vector.broadcast %cst_9 : f32 to vector<8x128xf32>
    %36 = arith.minimumf %34, %35 : vector<8x128xf32>
    %cst_10 = arith.constant 1.000000e+00 : f32
    %37 = vector.broadcast %cst_10 : f32 to vector<8x128xf32>
    %38 = arith.subf %37, %33 : vector<8x128xf32>
    %39 = arith.select %23, %33, %38 : vector<8x128xi1>, vector<8x128xf32>
    %cst_11 = arith.constant 9.800000e-01 : f32
    %40 = vector.broadcast %cst_11 : f32 to vector<8x128xf32>
    %41 = arith.mulf %40, %21 : vector<8x128xf32>
    %cst_12 = arith.constant 0.00999999977 : f32
    %42 = vector.broadcast %cst_12 : f32 to vector<8x128xf32>
    %43 = arith.addf %42, %41 : vector<8x128xf32>
    %cst_13 = arith.constant 1.000000e+00 : f32
    %44 = vector.broadcast %cst_13 : f32 to vector<8x128xf32>
    %45 = arith.subf %44, %33 : vector<8x128xf32>
    %46 = arith.mulf %43, %45 : vector<8x128xf32>
    %47 = arith.mulf %46, %45 : vector<8x128xf32>
    %48 = arith.mulf %47, %36 : vector<8x128xf32>
    %49 = arith.mulf %39, %21 : vector<8x128xf32>
    %50 = vector.shape_cast %49 : vector<8x128xf32> to vector<1x8x128xf32>
    %cst_14 = arith.constant dense<0.000000e+00> : vector<8x128xf32>
    %51 = vector.multi_reduction <add>, %50, %cst_14 [0] : vector<1x8x128xf32> to vector<8x128xf32>
    %52 = arith.addf %7, %51 : vector<8x128xf32>
    %53 = arith.mulf %39, %39 : vector<8x128xf32>
    %54 = vector.shape_cast %53 : vector<8x128xf32> to vector<1x8x128xf32>
    %cst_15 = arith.constant dense<0.000000e+00> : vector<8x128xf32>
    %55 = vector.multi_reduction <add>, %54, %cst_15 [0] : vector<1x8x128xf32> to vector<8x128xf32>
    %56 = arith.addf %7, %55 : vector<8x128xf32>
    %57 = arith.mulf %21, %21 : vector<8x128xf32>
    %58 = vector.shape_cast %57 : vector<8x128xf32> to vector<1x8x128xf32>
    %cst_16 = arith.constant dense<0.000000e+00> : vector<8x128xf32>
    %59 = vector.multi_reduction <add>, %58, %cst_16 [0] : vector<1x8x128xf32> to vector<8x128xf32>
    %60 = arith.addf %7, %59 : vector<8x128xf32>
    %61 = vector.shape_cast %48 : vector<8x128xf32> to vector<1x8x128xf32>
    %cst_17 = arith.constant dense<0.000000e+00> : vector<8x128xf32>
    %62 = vector.multi_reduction <add>, %61, %cst_17 [0] : vector<1x8x128xf32> to vector<8x128xf32>
    %63 = arith.addf %7, %62 : vector<8x128xf32>
    %c1_i32 = arith.constant 1 : i32
    %c0_18 = arith.constant 0 : index
    %c0_19 = arith.constant 0 : index
    %c0_20 = arith.constant 0 : index
    %c0_21 = arith.constant 0 : index
    %64 = vector.load %arg3[%c0_18, %c0_19, %c0_20, %c0_21] : memref<1x4x8x128xf32, #tpu.memory_space<vmem>>, vector<1x1x8x128xf32>
    %65 = vector.shape_cast %64 : vector<1x1x8x128xf32> to vector<8x128xf32>
    %66 = vector.shape_cast %52 : vector<8x128xf32> to vector<1x1x8x128xf32>
    tpu.vector_store %arg3[%c0_18, %c0_19, %c0_20, %c0_21], %66 {strides = array<i32>} : memref<1x4x8x128xf32, #tpu.memory_space<vmem>>, vector<1x1x8x128xf32>,
    %c0_22 = arith.constant 0 : index
    %c1 = arith.constant 1 : index
    %c0_23 = arith.constant 0 : index
    %c0_24 = arith.constant 0 : index
    %67 = vector.load %arg3[%c0_22, %c1, %c0_23, %c0_24] : memref<1x4x8x128xf32, #tpu.memory_space<vmem>>, vector<1x1x8x128xf32>
    %68 = vector.shape_cast %67 : vector<1x1x8x128xf32> to vector<8x128xf32>
    %69 = vector.shape_cast %56 : vector<8x128xf32> to vector<1x1x8x128xf32>
    tpu.vector_store %arg3[%c0_22, %c1, %c0_23, %c0_24], %69 {strides = array<i32>} : memref<1x4x8x128xf32, #tpu.memory_space<vmem>>, vector<1x1x8x128xf32>,
    %c0_25 = arith.constant 0 : index
    %c2 = arith.constant 2 : index
    %c0_26 = arith.constant 0 : index
    %c0_27 = arith.constant 0 : index
    %70 = vector.load %arg3[%c0_25, %c2, %c0_26, %c0_27] : memref<1x4x8x128xf32, #tpu.memory_space<vmem>>, vector<1x1x8x128xf32>
    %71 = vector.shape_cast %70 : vector<1x1x8x128xf32> to vector<8x128xf32>
    %72 = vector.shape_cast %60 : vector<8x128xf32> to vector<1x1x8x128xf32>
    tpu.vector_store %arg3[%c0_25, %c2, %c0_26, %c0_27], %72 {strides = array<i32>} : memref<1x4x8x128xf32, #tpu.memory_space<vmem>>, vector<1x1x8x128xf32>,
    %c0_28 = arith.constant 0 : index
    %c3 = arith.constant 3 : index
    %c0_29 = arith.constant 0 : index
    %c0_30 = arith.constant 0 : index
    %73 = vector.load %arg3[%c0_28, %c3, %c0_29, %c0_30] : memref<1x4x8x128xf32, #tpu.memory_space<vmem>>, vector<1x1x8x128xf32>
    %74 = vector.shape_cast %73 : vector<1x1x8x128xf32> to vector<8x128xf32>
    %75 = vector.shape_cast %63 : vector<8x128xf32> to vector<1x1x8x128xf32>
    tpu.vector_store %arg3[%c0_28, %c3, %c0_29, %c0_30], %75 {strides = array<i32>} : memref<1x4x8x128xf32, #tpu.memory_space<vmem>>, vector<1x1x8x128xf32>,
    return
  }
  func.func @transform_0(%arg0: i32) -> (i32, i32) {
    %c0_i32 = arith.constant 0 : i32
    %c0_i32_0 = arith.constant 0 : i32
    return %arg0, %c0_i32 : i32, i32
  }
  func.func @transform_1(%arg0: i32) -> (i32, i32) {
    %c0_i32 = arith.constant 0 : i32
    %c0_i32_0 = arith.constant 0 : i32
    return %arg0, %c0_i32 : i32, i32
  }
  func.func @transform_2(%arg0: i32) -> (i32, i32, i32, i32) {
    %c0_i32 = arith.constant 0 : i32
    %c0_i32_0 = arith.constant 0 : i32
    %c0_i32_1 = arith.constant 0 : i32
    %c0_i32_2 = arith.constant 0 : i32
    return %arg0, %c0_i32, %c0_i32_0, %c0_i32_1 : i32, i32, i32, i32
  }
}

</mosaic_0001>

<bundles_post_ra>
// kernel: squeeze.5
= control target key start
LH: loop header
LB: loop body
LE: loop exit
PB: predicated region body
PF: predicated region fallthrough
CT: control target
= control target key end

     0   :  { %2 = vsyncpa [#allocation1], 0  ;;  %s100_s8 = smov [#allocation0]   ;;  %s124_s0 = inlined_call_operand.hbm [shape: f32[2,1,16,16], index: 0, kind: input, shape index: {}]   ;;  %s125_s1 = inlined_call_operand.vmem [shape: f32[512], index: 1, kind: output, shape index: {}]  }
   0x1   :  { %s6_s0 = sshll.u32 %s124_s0, 4  ;;  %s8_s9 = sshll.u32 %s100_s8, 4  ;;  %s7_s0 = int_to_ptr.hbm [resolvable:$true] %s6_s0  ;;  %s9_s9 = int_to_ptr.vmem [resolvable:$true] %s8_s9 }
   0x2   :  { %11 = dma.hbm_to_vmem [thread:$0]  %s7_s0, 512, %s9_s9, [#allocation1]  }
   0x3   :  { %98 = dma.done.wait [#allocation1], 512  }
   0x4   :  { %99 = vsyncadd [#allocation1], 4294966784  ;;  %v18_v0 = vld [vmem:[#allocation0 + $0x7] ss:$8 sm:$0xf]   ;;  %s101_s10 = smov 112  }
   0x5   :  { %v30_v1 = vld [vmem:[#allocation0 + $0x5] ss:$8 sm:$0xf]   ;;  %19 = vrot.lane.b32.xlu0 %v18_v0, %s101_s10  ;;  %s102_s11 = smov 80   ;;  %s103_s12 = smov 48   ;;  %vm15_vm0 = vcmask 130048  }
   0x6   :  { %31 = vrot.lane.b32.xlu1 %v30_v1, %s102_s11  ;;  %v42_v2 = vld [vmem:[#allocation0 + $0x3] ss:$8 sm:$0xf]   ;;  %v24_v3 = vld [vmem:[#allocation0 + $0x6] ss:$8 sm:$0xf]  }
   0x7   :  { %43 = vrot.lane.b32.xlu2 %v42_v2, %s103_s12  ;;  %v36_v4 = vld [vmem:[#allocation0 + $0x4] ss:$8 sm:$0xf]   ;;  %v48_v5 = vld [vmem:[#allocation0 + $0x2] ss:$8 sm:$0xf]  }
   0x8   :  { %s104_s13 = smov 96   ;;  %s105_s14 = smov 64   ;;  %v54_v6 = vld [vmem:[#allocation0 + $0x1] ss:$8 sm:$0xf]   ;;  %vm21_vm1 = vcmask 1048448  }
   0x9   :  { %s106_s15 = smov 32   ;;  %s107_s16 = smov 16   ;;  %v14_v7 = vld [vmem:[#allocation0] ss:$8 sm:$0xf]   ;;  %vm27_vm2 = vcmask 917248  }
   0xa   :  { %16 = vst.msk [vmem:[#allocation2] sm:$0xf] %vm15_vm0, %v14_v7   ;;  %vm33_vm3 = vcmask 786048   ;;  %vm39_vm4 = vcmask 654848   ;;  %vm45_vm5 = vcmask 523648   ;;  %vm51_vm6 = vcmask 392448  }
   0xb   :  { %vm57_vm7 = vcmask 261248  }
   0xd   :  { %25 = vrot.lane.b32.xlu0 %v24_v3, %s104_s13 }
   0xe   :  { %37 = vrot.lane.b32.xlu1 %v36_v4, %s105_s14 }
   0xf   :  { %49 = vrot.lane.b32.xlu2 %v48_v5, %s106_s15 }
  0x15   :  { %55 = vrot.lane.b32.xlu0 %v54_v6, %s107_s16 }
  0x61   :  { %v44_v8 = vpop.permute.xlu2 %43  }
  0x69   :  { %v50_v9 = vpop.permute.xlu2 %49  }
  0x77   :  { %v20_v10 = vpop.permute.xlu0 %19  }
  0x78   :  { %v32_v11 = vpop.permute.xlu1 %31   ;;  %22 = vst.msk [vmem:[#allocation2] sm:$0xf] %vm21_vm1, %v20_v10  }
  0x7f   :  { %v26_v12 = vpop.permute.xlu0 %25  }
  0x80   :  { %v38_v13 = vpop.permute.xlu1 %37   ;;  %28 = vst.msk [vmem:[#allocation2] sm:$0xf] %vm27_vm2, %v26_v12  }
  0x81   :  { %34 = vst.msk [vmem:[#allocation2] sm:$0xf] %vm33_vm3, %v32_v11  }
  0x82   :  { %40 = vst.msk [vmem:[#allocation2] sm:$0xf] %vm39_vm4, %v38_v13  }
  0x83   :  { %46 = vst.msk [vmem:[#allocation2] sm:$0xf] %vm45_vm5, %v44_v8  }
  0x84   :  { %52 = vst.msk [vmem:[#allocation2] sm:$0xf] %vm51_vm6, %v50_v9  }
  0x87   :  { %v56_v14 = vpop.permute.xlu0 %55  }
  0x88   :  { %58 = vst.msk [vmem:[#allocation2] sm:$0xf] %vm57_vm7, %v56_v14  }
  0x8f   :  { %v61_v15 = vld [vmem:[#allocation2] sm:$0xf] }
  0x90   :  { %64 = vst [vmem:[%s125_s1] sm:$0xf] %v61_v15 }
  0x91   :  { %65 = vsyncpa [#allocation1], 1 }

// kernel: loss_forward.1
= control target key start
LH: loop header
LB: loop body
LE: loop exit
PB: predicated region body
PF: predicated region fallthrough
CT: control target
= control target key end

     0   :  { %v13_v0 = vlaneseq  ;;  %s130_s0 = inlined_call_operand.vmem [shape: f32[8,128], index: 0, kind: input, shape index: {}]   ;;  %s131_s1 = inlined_call_operand.vmem [shape: f32[8,128], index: 1, kind: input, shape index: {}]   ;;  %s132_s2 = inlined_call_operand.vmem [shape: f32[1,4,8,128], index: 2, kind: output, shape index: {}]  }
   0x1   :  { %v19_v5 = vld [vmem:[%s130_s0] sm:$0xff] }
   0x2   :  { %v14_v1 = vshrl.u32 %v13_v0, 7  ;;  %v17_v2 = vand.u32 127, %v13_v0  ;;  %v20_v6 = vld [vmem:[%s131_s1] sm:$0xff] }
   0x4   :  { %v15_v3 = vmul.u32 128, %v14_v1 }
   0x6   :  { %v18_v4 = vadd.s32 %v17_v2, %v15_v3 }
   0x8   :  { %vm22_vm0 = vcmp.lt.s32.totalorder %v18_v4, 512 }
   0x9   :  { %v23_v7 = vsel %vm22_vm0, %v19_v5, -1e+09  ;;  %v24_v8 = vsel %vm22_vm0, %v20_v6, 0.0 }
   0xa   :  { %vm25_vm1 = vcmp.gt.f32.partialorder %v24_v8, 0.5  ;;  %v26_v9 = vsub.f32 0.0, %v23_v7  ;;  %v70_v13 = vmul.f32 %v24_v8, %v24_v8  ;;  %v59_v26 = vmul.f32 0.98, %v24_v8 }
   0xc   :  { %v27_v10 = vsel %vm25_vm1, %v23_v7, %v26_v9  ;;  %87 = vst [vmem:[%s132_s2 + $0x10] sm:$0xff] %v70_v13  ;;  %v60_v32 = vadd.f32 0.01, %v59_v26 }
   0xd   :  { %v28_v11 = vsub.f32 0.0, %v27_v10 }
   0xf   :  { %v29_v12 = vmul.f32 1.442695, %v28_v11 }
  0x11   :  { %89 = vpow2.f32 %v29_v12 }
  0x17   :  { %v90_v14 = vpop.eup %89 }
  0x18   :  { %v31_v15 = vadd.f32 1.0, %v90_v14  ;;  %v50_v16 = vmul.f32 -0.5, %v90_v14  ;;  %v53_v21 = vand.u32 2147483647, %v90_v14 }
  0x1a   :  { %91 = vrcp.f32 %v31_v15  ;;  %v43_v19 = vand.u32 2147483648, %v31_v15  ;;  %v51_v20 = vadd.f32 1.0, %v50_v16  ;;  %vm37_vm2 = vweird.f32 %v31_v15 }
  0x1b   :  { %93 = vlog2.f32 %v31_v15  ;;  %v41_v24 = vand.u32 2147483647, %v31_v15  ;;  %vm54_vm6 = vcmp.lt.f32.partialorder %v53_v21, 0.0004427343 }
  0x1c   :  { %v44_v27 = vor.u32 1.1754944e-38, %v43_v19  ;;  %v52_v29 = vmul.f32 %v90_v14, %v51_v20 }
  0x1d   :  { %vm42_vm5 = vcmp.eq.f32.partialorder %v41_v24, 8.507059e+37 }
  0x20   :  { %v92_v17 = vpop.eup %91 }
  0x21   :  { %v33_v18 = vmul.f32 %v92_v17, %v31_v15  ;;  %v94_v22 = vpop.eup %93  ;;  %vm38_vm3 = vweird.f32 %v92_v17 }
  0x22   :  { %vm39_vm4 = vmor %vm37_vm2, %vm38_vm3  ;;  %v49_v28 = vmul.f32 0.6931472, %v94_v22 }
  0x23   :  { %v34_v23 = vsub.f32 1.0, %v33_v18 }
  0x24   :  { %v55_v34 = vsel %vm54_vm6, %v52_v29, %v49_v28 }
  0x25   :  { %v35_v25 = vmul.f32 %v92_v17, %v34_v23  ;;  %v56_v37 = vmin.f32 %v55_v34, 100.0 }
  0x27   :  { %v36_v30 = vadd.f32 %v92_v17, %v35_v25 }
  0x29   :  { %v40_v31 = vsel %vm39_vm4, %v92_v17, %v36_v30 }
  0x2a   :  { %v45_v33 = vsel %vm42_vm5, %v44_v27, %v40_v31 }
  0x2b   :  { %v57_v35 = vsub.f32 1.0, %v45_v33 }
  0x2d   :  { %v58_v36 = vsel %vm25_vm1, %v45_v33, %v57_v35  ;;  %v61_v38 = vmul.f32 %v60_v32, %v57_v35 }
  0x2e   :  { %v64_v39 = vmul.f32 %v58_v36, %v24_v8  ;;  %v67_v40 = vmul.f32 %v58_v36, %v58_v36 }
  0x2f   :  { %v62_v41 = vmul.f32 %v61_v38, %v57_v35 }
  0x30   :  { %75 = vst [vmem:[%s132_s2] sm:$0xff] %v64_v39 }
  0x31   :  { %86 = vst [vmem:[%s132_s2 + $0x8] sm:$0xff] %v67_v40  ;;  %v63_v42 = vmul.f32 %v62_v41, %v56_v37 }
  0x33   :  { %88 = vst [vmem:[%s132_s2 + $0x18] sm:$0xff] %v63_v42 }

</bundles_post_ra>
